<compile_context>
chip_gen: v7x
topology: tpu7x:2x2x1
jax: 0.10.0
libtpu: 0.0.40
codegen_flags: <defaults>
</compile_context>

<pallas_src>
import jax
import jax.numpy as jnp
import numpy as np
from jax.experimental import pallas as pl
from jax.experimental.pallas import tpu as pltpu


def _plane2space_kernel(kp_ref, d_ref, c_ref, o_ref):
    # kp_ref : SMEM (4N,) f32, per batch [1/fx, 1/fy, -cx/fx, -cy/fy]
    # d_ref  : VMEM (1, 1, R, L) depth tile
    # c_ref  : VMEM (1, 3, R, L) homogeneous coordinate tile
    # o_ref  : VMEM (1, 3, R, L) output 3D coordinates
    b = pl.program_id(0) * 4
    inv_fx = kp_ref[b + 0]
    inv_fy = kp_ref[b + 1]
    ncx = kp_ref[b + 2]
    ncy = kp_ref[b + 3]

    d = d_ref[0, 0].astype(jnp.float32)
    valid = (d != 0.0).astype(jnp.float32)   # valid_mask (before clamp)
    d_cl = jnp.maximum(d, 1e-5)              # clamp(min=1e-5)

    # Row 2 of K_inv first (needed by rows 0 and 1), then one output channel
    # at a time (load -> fma -> store) to minimize live (R, L) temporaries.
    z = c_ref[0, 2].astype(jnp.float32) * d_cl
    o_ref[0, 0] = ((c_ref[0, 0].astype(jnp.float32) * d_cl * inv_fx + z * ncx)
                   * valid).astype(o_ref.dtype)
    o_ref[0, 1] = ((c_ref[0, 1].astype(jnp.float32) * d_cl * inv_fy + z * ncy)
                   * valid).astype(o_ref.dtype)
    o_ref[0, 2] = (z * valid).astype(o_ref.dtype)


_TARGET_PIX = 1024 * 128   # ~3.5 MiB f32 across the 7 planes per grid step
_MIN_PIX = 256 * 128       # never shrink a tile below this when splitting


def _pick_tile_rows(total_rows, padded_lanes, n_batch):
    """Rows per grid step (multiple of 8, or the full row dim)."""
    r = max(1, _TARGET_PIX // padded_lanes)
    if n_batch == 1:
        # Aim for >= 4 pixel tiles so both v7x TensorCores get pipelined work,
        # but keep tiles >= _MIN_PIX (negligible cost on 1-TC v5e/v6e).
        r = min(r, max(_MIN_PIX // padded_lanes, (total_rows + 3) // 4))
    if r >= total_rows:
        return total_rows                      # single full-dim tile
    r = max(8, (r // 8) * 8)                   # (8, 128) sublane rule
    if r >= total_rows:
        return total_rows
    return r


def _call_kernel(kparams, depth4, coord4, rows, lanes, n, row_tile):
    grid = (n, pl.cdiv(rows, row_tile))
    return pl.pallas_call(
        _plane2space_kernel,
        out_shape=jax.ShapeDtypeStruct((n, 3, rows, lanes), jnp.float32),
        grid_spec=pltpu.PrefetchScalarGridSpec(
            num_scalar_prefetch=1,
            grid=grid,
            in_specs=[
                pl.BlockSpec((1, 1, row_tile, lanes),
                             lambda b, t, kp: (b, 0, t, 0)),
                pl.BlockSpec((1, 3, row_tile, lanes),
                             lambda b, t, kp: (b, 0, t, 0)),
            ],
            out_specs=pl.BlockSpec((1, 3, row_tile, lanes),
                                   lambda b, t, kp: (b, 0, t, 0)),
        ),
        compiler_params=pltpu.CompilerParams(
            dimension_semantics=("parallel", "parallel")),
    )(kparams, depth4, coord4)


def plane2space(depth, coordinate, camera_params):
    """depth: (N,1,H,W), coordinate: (N,3,H,W) NCHW.
    camera_params: {'intrinsic': {'fx','fy','cx','cy'}} scalars or (N,) arrays.
    Returns coord_3d: (N,3,H,W) float32."""
    N, _, H, W = depth.shape
    HW = H * W
    intr = camera_params['intrinsic']

    def _per_batch(v):
        return jnp.broadcast_to(jnp.asarray(v, jnp.float32), (N,))

    fx, fy = _per_batch(intr['fx']), _per_batch(intr['fy'])
    cx, cy = _per_batch(intr['cx']), _per_batch(intr['cy'])
    # Precomputed K_inv entries, flat 1-D for cheap SMEM residency.
    kparams = jnp.stack([1.0 / fx, 1.0 / fy, -cx / fx, -cy / fy],
                        axis=1).reshape(-1)                       # (4N,)

    if 128 <= W <= 16384:
        # Fast path: tile native NCHW directly — zero wrapper copies.
        padded_lanes = ((W + 127) // 128) * 128
        row_tile = _pick_tile_rows(H, padded_lanes, N)
        return _call_kernel(kparams, depth, coordinate, H, W, N, row_tile)

    # Small-width fallback: dense (rows, 128) slabs.
    rows = pl.cdiv(HW, 128)
    HW_pad = rows * 128
    pad = HW_pad - HW
    d_flat = depth.reshape(N, HW)
    c_flat = coordinate.reshape(N, 3, HW)
    if pad:
        # Zero pad -> depth == 0 -> valid_mask == 0 -> padded outputs are 0.
        d_flat = jnp.pad(d_flat, ((0, 0), (0, pad)))
        c_flat = jnp.pad(c_flat, ((0, 0), (0, 0), (0, pad)))
    d_slab = d_flat.reshape(N, 1, rows, 128)
    c_slab = c_flat.reshape(N, 3, rows, 128)
    row_tile = _pick_tile_rows(rows, 128, N)
    out = _call_kernel(kparams, d_slab, c_slab, rows, 128, N, row_tile)
    out = out.reshape(N, 3, HW_pad)
    if pad:
        out = out[:, :, :HW]
    return out.reshape(N, 3, H, W)


def _reference(depth, coordinate, camera_params):
    # Pure-JAX reference mirroring the PyTorch module.
    N, _, H, W = depth.shape
    intr = camera_params['intrinsic']
    fx = jnp.broadcast_to(jnp.asarray(intr['fx'], jnp.float32), (N,))
    fy = jnp.broadcast_to(jnp.asarray(intr['fy'], jnp.float32), (N,))
    cx = jnp.broadcast_to(jnp.asarray(intr['cx'], jnp.float32), (N,))
    cy = jnp.broadcast_to(jnp.asarray(intr['cy'], jnp.float32), (N,))
    valid = 1.0 - (depth == 0.0).astype(jnp.float32)
    d = jnp.maximum(depth.astype(jnp.float32), 1e-5)
    K_inv = jnp.zeros((N, 3, 3), jnp.float32)
    K_inv = K_inv.at[:, 0, 0].set(1.0 / fx)
    K_inv = K_inv.at[:, 1, 1].set(1.0 / fy)
    K_inv = K_inv.at[:, 2, 2].set(1.0)
    K_inv = K_inv.at[:, 0, 2].set(-cx / fx)
    K_inv = K_inv.at[:, 1, 2].set(-cy / fy)
    m = (coordinate.astype(jnp.float32) * d).reshape(N, 3, H * W)
    c3d = jnp.matmul(K_inv, m, precision=jax.lax.Precision.HIGHEST)
    return c3d.reshape(N, 3, H, W) * valid


def _make_case(key, N, H, W):
    k1, k2, k3 = jax.random.split(key, 3)
    depth = jax.random.uniform(k1, (N, 1, H, W), jnp.float32, 0.0, 10.0)
    zero_mask = jax.random.bernoulli(k2, 0.2, (N, 1, H, W))
    depth = jnp.where(zero_mask, 0.0, depth)    # exact zeros -> valid_mask path
    u = jnp.broadcast_to(jnp.arange(W, dtype=jnp.float32)[None, None, None, :],
                         (N, 1, H, W))
    v = jnp.broadcast_to(jnp.arange(H, dtype=jnp.float32)[None, None, :, None],
                         (N, 1, H, W))
    ones = jnp.ones((N, 1, H, W), jnp.float32)
    coordinate = jnp.concatenate([u, v, ones], axis=1)   # (N, 3, H, W)
    base = jax.random.uniform(k3, (4, N), jnp.float32, 0.5, 2.0)
    camera_params = {'intrinsic': {
        'fx': 100.0 * base[0], 'fy': 100.0 * base[1],
        'cx': (W / 2.0) * base[2], 'cy': (H / 2.0) * base[3]}}
    return depth, coordinate, camera_params


if __name__ == "__main__":
    key = jax.random.PRNGKey(0)
    # (slab no-pad), (NCHW lane-aligned), (NCHW unaligned W), (slab with pad)
    cases = [(2, 16, 16), (1, 16, 128), (2, 12, 160), (2, 10, 10)]
    keys = jax.random.split(key, len(cases))
    for k, (N, H, W) in zip(keys, cases):
        depth, coordinate, camera_params = _make_case(k, N, H, W)
        out = plane2space(depth, coordinate, camera_params)
        out = jax.block_until_ready(out)
        ref = _reference(depth, coordinate, camera_params)
        np.testing.assert_allclose(np.asarray(out), np.asarray(ref),
                                   rtol=1e-5, atol=1e-4)
    print("KERNEL_OK")
</pallas_src>

<mosaic_0001>
module attributes {stable_mosaic.version = 11 : i64} {
  func.func @_plane2space_kernel(%arg0: i32, %arg1: i32, %arg2: memref<8xf32, #tpu.memory_space<smem>>, %arg3: memref<1x1x2x128xf32, #tpu.memory_space<vmem>>, %arg4: memref<1x3x2x128xf32, #tpu.memory_space<vmem>>, %arg5: memref<1x3x2x128xf32, #tpu.memory_space<vmem>>) attributes {dimension_semantics = [#tpu.dimension_semantics<parallel>, #tpu.dimension_semantics<parallel>], iteration_bounds = array<i64: 2, 1>, scalar_prefetch = 1 : i64, scratch_operands = 0 : i64, tpu.core_type = #tpu.core_type<tc>, window_params = [{transform_indices = @transform_0, window_bounds = array<i64: 1, 1, 2, 128>}, {transform_indices = @transform_1, window_bounds = array<i64: 1, 3, 2, 128>}, {transform_indices = @transform_2, window_bounds = array<i64: 1, 3, 2, 128>}]} {
    %c4_i32 = arith.constant 4 : i32
    %0 = arith.muli %arg0, %c4_i32 : i32
    %c0_i32 = arith.constant 0 : i32
    %1 = arith.addi %0, %c0_i32 : i32
    %2 = arith.index_cast %1 : i32 to index
    %3 = memref.load %arg2[%2] : memref<8xf32, #tpu.memory_space<smem>>
    %c1_i32 = arith.constant 1 : i32
    %4 = arith.addi %0, %c1_i32 : i32
    %5 = arith.index_cast %4 : i32 to index
    %6 = memref.load %arg2[%5] : memref<8xf32, #tpu.memory_space<smem>>
    %c2_i32 = arith.constant 2 : i32
    %7 = arith.addi %0, %c2_i32 : i32
    %8 = arith.index_cast %7 : i32 to index
    %9 = memref.load %arg2[%8] : memref<8xf32, #tpu.memory_space<smem>>
    %c3_i32 = arith.constant 3 : i32
    %10 = arith.addi %0, %c3_i32 : i32
    %11 = arith.index_cast %10 : i32 to index
    %12 = memref.load %arg2[%11] : memref<8xf32, #tpu.memory_space<smem>>
    %c0 = arith.constant 0 : index
    %c0_0 = arith.constant 0 : index
    %c0_1 = arith.constant 0 : index
    %c0_2 = arith.constant 0 : index
    %13 = vector.load %arg3[%c0, %c0_0, %c0_1, %c0_2] : memref<1x1x2x128xf32, #tpu.memory_space<vmem>>, vector<1x1x2x128xf32>
    %14 = vector.shape_cast %13 : vector<1x1x2x128xf32> to vector<2x128xf32>
    %cst = arith.constant 0.000000e+00 : f32
    %15 = vector.broadcast %cst : f32 to vector<2x128xf32>
    %16 = arith.cmpf one, %14, %15 : vector<2x128xf32>
    %17 = arith.extui %16 : vector<2x128xi1> to vector<2x128xi32>
    %18 = arith.sitofp %17 : vector<2x128xi32> to vector<2x128xf32>
    %cst_3 = arith.constant 9.99999974E-6 : f32
    %19 = vector.broadcast %cst_3 : f32 to vector<2x128xf32>
    %20 = arith.maximumf %14, %19 : vector<2x128xf32>
    %c0_4 = arith.constant 0 : index
    %c2 = arith.constant 2 : index
    %c0_5 = arith.constant 0 : index
    %c0_6 = arith.constant 0 : index
    %21 = vector.load %arg4[%c0_4, %c2, %c0_5, %c0_6] : memref<1x3x2x128xf32, #tpu.memory_space<vmem>>, vector<1x1x2x128xf32>
    %22 = vector.shape_cast %21 : vector<1x1x2x128xf32> to vector<2x128xf32>
    %23 = arith.mulf %22, %20 : vector<2x128xf32>
    %c0_7 = arith.constant 0 : index
    %c0_8 = arith.constant 0 : index
    %c0_9 = arith.constant 0 : index
    %c0_10 = arith.constant 0 : index
    %24 = vector.load %arg4[%c0_7, %c0_8, %c0_9, %c0_10] : memref<1x3x2x128xf32, #tpu.memory_space<vmem>>, vector<1x1x2x128xf32>
    %25 = vector.shape_cast %24 : vector<1x1x2x128xf32> to vector<2x128xf32>
    %26 = arith.mulf %25, %20 : vector<2x128xf32>
    %27 = vector.broadcast %3 : f32 to vector<2x128xf32>
    %28 = arith.mulf %26, %27 : vector<2x128xf32>
    %29 = vector.broadcast %9 : f32 to vector<2x128xf32>
    %30 = arith.mulf %23, %29 : vector<2x128xf32>
    %31 = arith.addf %28, %30 : vector<2x128xf32>
    %32 = arith.mulf %31, %18 : vector<2x128xf32>
    %c0_11 = arith.constant 0 : index
    %c0_12 = arith.constant 0 : index
    %c0_13 = arith.constant 0 : index
    %c0_14 = arith.constant 0 : index
    %33 = vector.load %arg5[%c0_11, %c0_12, %c0_13, %c0_14] : memref<1x3x2x128xf32, #tpu.memory_space<vmem>>, vector<1x1x2x128xf32>
    %34 = vector.shape_cast %33 : vector<1x1x2x128xf32> to vector<2x128xf32>
    %35 = vector.shape_cast %32 : vector<2x128xf32> to vector<1x1x2x128xf32>
    tpu.vector_store %arg5[%c0_11, %c0_12, %c0_13, %c0_14], %35 {strides = array<i32>} : memref<1x3x2x128xf32, #tpu.memory_space<vmem>>, vector<1x1x2x128xf32>,
    %c0_15 = arith.constant 0 : index
    %c1 = arith.constant 1 : index
    %c0_16 = arith.constant 0 : index
    %c0_17 = arith.constant 0 : index
    %36 = vector.load %arg4[%c0_15, %c1, %c0_16, %c0_17] : memref<1x3x2x128xf32, #tpu.memory_space<vmem>>, vector<1x1x2x128xf32>
    %37 = vector.shape_cast %36 : vector<1x1x2x128xf32> to vector<2x128xf32>
    %38 = arith.mulf %37, %20 : vector<2x128xf32>
    %39 = vector.broadcast %6 : f32 to vector<2x128xf32>
    %40 = arith.mulf %38, %39 : vector<2x128xf32>
    %41 = vector.broadcast %12 : f32 to vector<2x128xf32>
    %42 = arith.mulf %23, %41 : vector<2x128xf32>
    %43 = arith.addf %40, %42 : vector<2x128xf32>
    %44 = arith.mulf %43, %18 : vector<2x128xf32>
    %c0_18 = arith.constant 0 : index
    %c1_19 = arith.constant 1 : index
    %c0_20 = arith.constant 0 : index
    %c0_21 = arith.constant 0 : index
    %45 = vector.load %arg5[%c0_18, %c1_19, %c0_20, %c0_21] : memref<1x3x2x128xf32, #tpu.memory_space<vmem>>, vector<1x1x2x128xf32>
    %46 = vector.shape_cast %45 : vector<1x1x2x128xf32> to vector<2x128xf32>
    %47 = vector.shape_cast %44 : vector<2x128xf32> to vector<1x1x2x128xf32>
    tpu.vector_store %arg5[%c0_18, %c1_19, %c0_20, %c0_21], %47 {strides = array<i32>} : memref<1x3x2x128xf32, #tpu.memory_space<vmem>>, vector<1x1x2x128xf32>,
    %48 = arith.mulf %23, %18 : vector<2x128xf32>
    %c0_22 = arith.constant 0 : index
    %c2_23 = arith.constant 2 : index
    %c0_24 = arith.constant 0 : index
    %c0_25 = arith.constant 0 : index
    %49 = vector.load %arg5[%c0_22, %c2_23, %c0_24, %c0_25] : memref<1x3x2x128xf32, #tpu.memory_space<vmem>>, vector<1x1x2x128xf32>
    %50 = vector.shape_cast %49 : vector<1x1x2x128xf32> to vector<2x128xf32>
    %51 = vector.shape_cast %48 : vector<2x128xf32> to vector<1x1x2x128xf32>
    tpu.vector_store %arg5[%c0_22, %c2_23, %c0_24, %c0_25], %51 {strides = array<i32>} : memref<1x3x2x128xf32, #tpu.memory_space<vmem>>, vector<1x1x2x128xf32>,
    return
  }
  func.func @transform_0(%arg0: i32, %arg1: i32, %arg2: memref<8xf32, #tpu.memory_space<smem>>) -> (i32, i32, i32, i32) {
    %c0_i32 = arith.constant 0 : i32
    %c0_i32_0 = arith.constant 0 : i32
    %c0_i32_1 = arith.constant 0 : i32
    return %arg0, %c0_i32, %arg1, %c0_i32_0 : i32, i32, i32, i32
  }
  func.func @transform_1(%arg0: i32, %arg1: i32, %arg2: memref<8xf32, #tpu.memory_space<smem>>) -> (i32, i32, i32, i32) {
    %c0_i32 = arith.constant 0 : i32
    %c0_i32_0 = arith.constant 0 : i32
    %c0_i32_1 = arith.constant 0 : i32
    return %arg0, %c0_i32, %arg1, %c0_i32_0 : i32, i32, i32, i32
  }
  func.func @transform_2(%arg0: i32, %arg1: i32, %arg2: memref<8xf32, #tpu.memory_space<smem>>) -> (i32, i32, i32, i32) {
    %c0_i32 = arith.constant 0 : i32
    %c0_i32_0 = arith.constant 0 : i32
    %c0_i32_1 = arith.constant 0 : i32
    return %arg0, %c0_i32, %arg1, %c0_i32_0 : i32, i32, i32, i32
  }
}

</mosaic_0001>

<bundles_post_ra>
// kernel: tpu_custom_call.1
= control target key start
LH: loop header
LB: loop body
LE: loop exit
PB: predicated region body
PF: predicated region fallthrough
CT: control target
= control target key end

     0   :  { %s909_s0 = inlined_call_operand.hbm [shape: f32[8], index: 0, kind: input, shape index: {}]   ;;  %s910_s1 = inlined_call_operand.hbm [shape: f32[2,1,2,128], index: 1, kind: input, shape index: {}]   ;;  %s911_s2 = inlined_call_operand.hbm [shape: f32[2,3,2,128], index: 2, kind: input, shape index: {}]   ;;  %s912_s3 = inlined_call_operand.hbm [shape: f32[2,3,2,128], index: 3, kind: output, shape index: {}]  }
   0x1   :  { %s482_s14 = scalar_lea.hbm %s909_s0, 16 }
   0x2   :  { %p483_p0 = scmp.ne.s32.totalorder %s909_s0, %s482_s14  ;;  %p486_p1 = scmp.lt.u32.totalorder %s482_s14, %s909_s0 }
   0x4   :  { %p488_p2 = pnand %p486_p1, %p483_p0 }
   0x6   :  { %491 = shalt.err (!%p488_p2)  }
   0x7   :  { %s642_s19 = smov [#allocation3]  }
   0x8   :  { %9 = dma.hbm_to_smem %s909_s0, 16, %s642_s19, [#allocation2] }
   0x9   :  { %604 = dma.done.wait [#allocation2], 16 }
   0xa   :  { %605 = vsyncadd [#allocation2], 4294967280 }
   0xb   :  { %11 = sfence }
   0xc   :  { %12 = vsyncpa [#allocation5], 0 }
   0xd   :  { %14 = vsyncpa [#allocation5 + $0x1], 0 }
   0xe   :  { %15 = vsyncpa [#allocation8], 0 }
   0xf   :  { %17 = vsyncpa [#allocation8 + $0x1], 0 }
  0x10   :  { %18 = vsyncpa [#allocation6], 0 }
  0x11   :  { %20 = vsyncpa [#allocation6 + $0x1], 0  ;;  %s683_s22 = smov 0   ;;  %s685_s23 = smov 0  }
  0x12   :  { %s687_s24 = smov 0   ;;  %s689_s25 = smov 0  }
  0x13   :  { %s691_s26 = smov 0   ;;  %s693_s0 = smov 0  }
  0x14 LB: > { %s387_s27 = sadd.s32 4294967295, %s640_s0   ;;  %s388_s28 = sadd.s32 4294967294, %s640_s0   ;;  %s640_s0 = sphi %s693_s0, %s26_s0   ;;  %s636_s26 = sphi %s691_s26, %s931_s26   ;;  %s632_s25 = sphi %s689_s25, %s930_s25   ;;  %s628_s24 = sphi %s687_s24, %s929_s24   ;;  %s624_s23 = sphi %s685_s23, %s928_s23   ;;  %s620_s22 = sphi %s683_s22, %s927_s22  }
  0x15   : > { %s38_s29 = sadd.s32 1, %s636_s26  ;;  %s47_s30 = sadd.s32 1, %s628_s24 }
  0x16   : > { %p40_p3 = scmp.ge.s32.totalorder %s38_s29, 2  ;;  %p54_p4 = scmp.ne.s32.totalorder %s628_s24, %s624_s23 }
  0x17   : > { %p55_p5 = scmp.eq.s32.totalorder %s640_s0, 0  ;;  %p60_p6 = scmp.ne.s32.totalorder %s624_s23, %s620_s22 }
  0x18   : > { %s933_s29 = smov (%p40_p3, %s38_s29), 0  ;;  %p61_p8 = scmp.eq.s32.totalorder %s387_s27, 0 }
  0x19   : > { %p724_p7 = por %p55_p5, %p54_p4  ;;  %s42_s5 = ssub.s32 %s636_s26, %s933_s29 }
  0x1a   : > { %p114_p9 = scmp.eq.s32.totalorder %s387_s27, 1  ;;  %p45_p10 = scmp.eq.s32.totalorder %s42_s5, 0 }
  0x1b   : > { %p730_p11 = por %p61_p8, %p60_p6  ;;  %p120_p13 = scmp.eq.s32.totalorder %s388_s28, 1 }
  0x1c   : > { %p734_p12 = por %p114_p9, %p54_p4  ;;  %p426_p2 = scmp.lt.s32.totalorder %s640_s0, 2 }
  0x1d   : > { %s916_s6 = scalar_select %p730_p11, 1, 0 }
  0x1e   : > { %s917_s7 = scalar_select %p734_p12, 1, 0 }
  0x1f   : > { %s739_s8 = scalar_select %p45_p10, %s628_s24, %s47_s30  }
  0x20   : > { %p741_p0 = por %p120_p13, %p60_p6  ;;  %s748_s10 = sand.u32 1, %s628_s24  }
  0x21   : > { %s391_s11 = sshll.u32 %s748_s10, 1  ;;  %s392_s12 = sshll.u32 %s636_s26, 5 }
  0x22   : > { %s918_s9 = scalar_select %p741_p0, 1, 0 }
  0x23   : > { %s755_s15 = scalar_lea.hbm %s910_s1, %s392_s12  ;;  %s144_s16 = scalar_lea.vmem [#allocation4], %s391_s11 }
  0x24   : > { %s152_s17 = sshll.u32 %s144_s16, 4  ;;  %p761_p3 = pnand %p426_p2, %p724_p7  ;;  %s757_s17 = int_to_ptr.vmem [resolvable:$true] %s152_s17 }
  0x25   : > { %s141_s19 = scalar_lea.sflag [#allocation5], %s748_s10  ;;  %s492_s20 = scalar_lea.hbm %s755_s15, 32 }
  0x26   : > { %p493_p6 = scmp.ne.s32.totalorder %s755_s15, %s492_s20  ;;  %p494_p8 = pneg %p761_p3 }
  0x27   : > { %s497_s28 = scalar_lea.hbm %s910_s1, 64  ;;  %p498_p7 = scmp.lt.u32.totalorder %s755_s15, %s910_s1 }
  0x28   : > { %p495_p9 = pnand %p494_p8, %p493_p6  ;;  %p499_p13 = scmp.lt.u32.totalorder %s497_s28, %s492_s20 }
  0x29   : > { %p501_p1 = scmp.lt.u32.totalorder %s492_s20, %s755_s15 }
  0x2a   : > { %p496_p10 = pneg %p495_p9  ;;  %p500_p2 = por %p499_p13, %p498_p7 }
  0x2c   : > { %p502_p4 = por %p501_p1, %p500_p2 }
  0x2e   : > { %p503_p5 = pnand %p502_p4, %p496_p10 }
  0x30   : > { %506 = shalt.err (!%p503_p5)
}
  0x31   : > { %s507_s5 = scalar_lea.vmem %s757_s17, 32  ;;  %s643_s11 = smov [#allocation4]  }
  0x32   : > { %p508_p6 = scmp.ne.s32.totalorder %s757_s17, %s507_s5  ;;  %s512_s12 = sshll.u32 %s643_s11, 4  ;;  %s513_s12 = int_to_ptr.vmem [resolvable:$false] %s512_s12 }
  0x33   : > { %s514_s13 = scalar_lea.vmem %s513_s12, 64  ;;  %p515_p12 = scmp.lt.s32.totalorder %s757_s17, %s513_s12 }
  0x34   : > { %p510_p9 = pnand %p508_p6, %p494_p8  ;;  %p516_p7 = scmp.lt.s32.totalorder %s514_s13, %s507_s5 }
  0x36   : > { %p511_p0 = pneg %p510_p9  ;;  %p517_p13 = por %p516_p7, %p515_p12 }
  0x38   : > { %p518_p1 = pnand %p517_p13, %p511_p0 }
  0x3a   : > { %521 = shalt.err (!%p518_p1)
}
  0x3b   : > { %418 = dma.hbm_to_vmem [thread:$0]  (!%p761_p3), %s755_s15, 32, %s757_s17, %s141_s19  }
  0x3c   : > { %p920_p4 = scmp.lt.s32.totalorder %s640_s0, 3  ;;  %p921_p5 = scmp.ge.s32.totalorder %s640_s0, 1 }
  0x3d   : > { %s405_s16 = smul.u32 6, %s748_s10  ;;  %s160_s15 = scalar_lea.sflag [#allocation8], %s748_s10 }
  0x3e   : > { %p797_p10 = pnand %p921_p5, %p920_p4  ;;  %s406_s20 = smul.u32 96, %s636_s26 }
  0x3f   : > { %s163_s30 = scalar_lea.vmem [#allocation7], %s405_s16  ;;  %s527_s11 = scalar_lea.hbm %s911_s2, 192 }
  0x40   : > { %s806_s28 = scalar_lea.hbm %s911_s2, %s406_s20  ;;  %s171_s4 = sshll.u32 %s163_s30, 4  ;;  %s808_s4 = int_to_ptr.vmem [resolvable:$true] %s171_s4 }
  0x41   : > { %s522_s17 = scalar_lea.hbm %s806_s28, 96  ;;  %p528_p6 = scmp.lt.u32.totalorder %s806_s28, %s911_s2 }
  0x42   : > { %p523_p12 = scmp.ne.s32.totalorder %s806_s28, %s522_s17  ;;  %p529_p9 = scmp.lt.u32.totalorder %s527_s11, %s522_s17 }
  0x43   : > { %p531_p13 = scmp.lt.u32.totalorder %s522_s17, %s806_s28 }
  0x44   : > { %p525_p0 = pnand %p523_p12, %p494_p8  ;;  %p530_p7 = por %p529_p9, %p528_p6 }
  0x46   : > { %p526_p2 = pneg %p525_p0  ;;  %p532_p1 = por %p531_p13, %p530_p7 }
  0x48   : > { %p533_p4 = pnand %p532_p1, %p526_p2 }
  0x4a   : > { %536 = shalt.err (!%p533_p4)
}
  0x4b   : > { %s537_s16 = scalar_lea.vmem %s808_s4, 96  ;;  %s644_s20 = smov [#allocation7]  }
  0x4c   : > { %p538_p5 = scmp.ne.s32.totalorder %s808_s4, %s537_s16  ;;  %s542_s21 = sshll.u32 %s644_s20, 4  ;;  %s543_s21 = int_to_ptr.vmem [resolvable:$false] %s542_s21 }
  0x4d   : > { %s544_s27 = scalar_lea.vmem %s543_s21, 192  ;;  %p545_p11 = scmp.lt.s32.totalorder %s808_s4, %s543_s21 }
  0x4e   : > { %p540_p12 = pnand %p538_p5, %p494_p8  ;;  %p546_p6 = scmp.lt.s32.totalorder %s544_s27, %s537_s16 }
  0x50   : > { %p541_p0 = pneg %p540_p12  ;;  %p547_p9 = por %p546_p6, %p545_p11 }
  0x52   : > { %p548_p7 = pnand %p547_p9, %p541_p0 }
  0x54   : > { %551 = shalt.err (!%p548_p7)
}
  0x55   : > { %s645_s30 = smov 32   ;;  %s646_s17 = smov 2  }
  0x56   : > { %421 = dma.hbm_to_vmem [thread:$0]  (!%p761_p3), %s806_s28, 96, %s808_s4, %s160_s15, %s645_s30, %s645_s30, %s646_s17  }
  0x57   : > { %183 = sbr.rel (%p797_p10) target bundleno = 131 (0x83), region = 28  ;;  %s839_s19 = sand.u32 (!%p797_p10), 1, %s624_s23  }
  0x58   : > { %s395_s5 = sshll.u32 (!%p797_p10), %s839_s19, 1  ;;  %s186_s11 = scalar_lea.sflag (!%p797_p10), [#allocation5], %s839_s19 }
  0x59   : > { %s189_s12 = scalar_lea.vmem (!%p797_p10), [#allocation4], %s395_s5  ;;  %p923_p11 = scmp.ne.s32.totalorder (!%p797_p10), %s916_s6, 0 }
  0x5e   : > { %607 = dma.done.wait (%p923_p11), %s186_s11, 32  }
  0x5f   : > { %609 = vsyncadd (%p923_p11), %s186_s11, 4294967264  ;;  %s407_s10 = smul.u32 6, %s839_s19  ;;  %s195_s18 = scalar_lea.sflag [#allocation8], %s839_s19 }
  0x61   : > { %s198_s14 = scalar_lea.vmem [#allocation7], %s407_s10 }
  0x62   : > { %611 = dma.done.wait (%p923_p11), %s195_s18, 96  }
  0x63   : > { %613 = vsyncadd (%p923_p11), %s195_s18, 4294967200  ;;  %s396_s28 = sshll.u32 %s632_s25, 2  ;;  %v232_v0 = vld [vmem:[%s189_s12] sm:$0x3]  ;;  %v398_v1 = vld [vmem:[%s198_s14 + $0x4] sm:$0x3] }
  0x64   : > { %s225_s4 = sld [smem:[#allocation3 + %s396_s28]]  ;;  %s228_s15 = sadd.s32 2, %s396_s28  ;;  %v240_v2 = vld [vmem:[%s198_s14] sm:$0x3]  ;;  %vm233_vm0 = vcmp.ne.f32.partialorder %v232_v0, 0.0  ;;  %v647_v5 = vmov 0.0  }
  0x65   : > { %s229_s13 = sld [smem:[#allocation3 + %s228_s15]]  ;;  %s226_s16 = sadd.s32 1, %s396_s28  ;;  %v236_v3 = vmax.f32 %v232_v0, 1e-05  ;;  %v399_v4 = vld [vmem:[%s198_s14 + $0x2] sm:$0x3] }
  0x66   : > { %s227_s20 = sld [smem:[#allocation3 + %s226_s16]]  ;;  %s230_s21 = sadd.s32 3, %s396_s28  ;;  %v397_v6 = vsel %vm233_vm0, 1.0, %v647_v5 }
  0x67   : > { %s231_s27 = sld [smem:[#allocation3 + %s230_s21]]  ;;  %v239_v9 = vmul.f32 %v398_v1, %v236_v3  ;;  %v241_v10 = vmul.f32 %v240_v2, %v236_v3  ;;  %v251_v11 = vmul.f32 %v399_v4, %v236_v3  ;;  %s223_s6 = scalar_lea.vmem [#allocation9], %s407_s10 }
  0x68   : > { %s278_s30 = sshll.u32 %s223_s6, 4  ;;  %s408_s17 = smul.u32 96, %s632_s25  ;;  %s855_s30 = int_to_ptr.vmem [resolvable:$true] %s278_s30 }
  0x69   : > { %v260_v18 = vmul.f32 %v397_v6, %v239_v9  ;;  %s264_s10 = scalar_lea.sflag [#allocation6], %s839_s19  ;;  %s552_s25 = scalar_lea.vmem %s855_s30, 96 }
  0x6a   : > { %v242_v7 = vstv %s225_s4  ;;  %s860_s12 = scalar_lea.hbm %s912_s3, %s408_s17  ;;  %p553_p3 = scmp.ne.s32.totalorder %s855_s30, %s552_s25 }
  0x6b   : > { %v244_v8 = vstv %s229_s13  ;;  %v243_v14 = vmul.f32 %v242_v7, %v241_v10  ;;  %401 = vst [vmem:[%s223_s6 + $0x4] sm:$0x3] %v260_v18  ;;  %p924_p8 = scmp.ne.s32.totalorder %s917_s7, 0  ;;  %s648_s18 = smov [#allocation9]  }
  0x6c   : > { %v252_v12 = vstv %s227_s20  ;;  %v245_v15 = vmul.f32 %v244_v8, %v239_v9  ;;  %s556_s14 = sshll.u32 %s648_s18, 4  ;;  %s557_s14 = int_to_ptr.vmem [resolvable:$false] %s556_s14 }
  0x6d   : > { %v254_v13 = vstv %s231_s27  ;;  %v253_v16 = vmul.f32 %v252_v12, %v251_v11  ;;  %p554_p10 = pnand %p553_p3, %p924_p8  ;;  %s558_s28 = scalar_lea.vmem %s557_s14, 192 }
  0x6e   : > { %v255_v17 = vmul.f32 %v254_v13, %v239_v9  ;;  %v246_v19 = vadd.f32 %v245_v15, %v243_v14  ;;  %p559_p13 = scmp.lt.s32.totalorder %s855_s30, %s557_s14  ;;  %p560_p1 = scmp.lt.s32.totalorder %s558_s28, %s552_s25 }
  0x6f   : > { %p555_p2 = pneg %p554_p10 }
  0x70   : > { %v256_v20 = vadd.f32 %v255_v17, %v253_v16  ;;  %v247_v21 = vmul.f32 %v397_v6, %v246_v19  ;;  %p561_p4 = por %p560_p1, %p559_p13 }
  0x72   : > { %v257_v22 = vmul.f32 %v397_v6, %v256_v20  ;;  %248 = vst [vmem:[%s223_s6] sm:$0x3] %v247_v21  ;;  %p562_p5 = pnand %p561_p4, %p555_p2 }
  0x74   : > { %400 = vst [vmem:[%s223_s6 + $0x2] sm:$0x3] %v257_v22 }
  0x75   : > { %565 = shalt.err (!%p562_p5)
}
  0x76   : > { %s566_s4 = scalar_lea.hbm %s860_s12, 96  ;;  %s570_s16 = scalar_lea.hbm %s912_s3, 192 }
  0x77   : > { %p567_p12 = scmp.ne.s32.totalorder %s860_s12, %s566_s4  ;;  %p571_p9 = scmp.lt.u32.totalorder %s860_s12, %s912_s3 }
  0x78   : > { %p572_p7 = scmp.lt.u32.totalorder %s570_s16, %s566_s4  ;;  %p574_p3 = scmp.lt.u32.totalorder %s566_s4, %s860_s12 }
  0x79   : > { %p568_p0 = pnand %p567_p12, %p924_p8 }
  0x7a   : > { %p573_p11 = por %p572_p7, %p571_p9 }
  0x7b   : > { %p569_p6 = pneg %p568_p0 }
  0x7c   : > { %p575_p10 = por %p574_p3, %p573_p11 }
  0x7e   : > { %p576_p2 = pnand %p575_p10, %p569_p6 }
  0x80   : > { %579 = shalt.err (!%p576_p2)
}
  0x81   : > { %s649_s27 = smov 32   ;;  %s650_s6 = smov 2  }
  0x82   : > { %413 = dma.vmem_to_hbm [thread:$0]  (%p924_p8), %s855_s30, 96, %s860_s12, %s264_s10, %s649_s27, %s649_s27, %s650_s6  }
  0x83 PF: > { %s293_s17 = sand.u32 1, %s620_s22   ;;  %p925_p13 = scmp.ne.s32.totalorder %s918_s9, 0 }
  0x84   : > { %p926_p1 = scmp.ge.s32.totalorder %s640_s0, 2  ;;  %s294_s5 = scalar_lea.sflag [#allocation6], %s293_s17 }
  0x86   : > { %p423_p4 = pnand %p926_p1, %p925_p13 }
  0x88   : > { %615 = dma.done.wait (!%p423_p4), %s294_s5, 96  }
  0x89   : > { %617 = vsyncadd (!%p423_p4), %s294_s5, 4294967200  ;;  %s26_s0 = sadd.s32 1, %s640_s0   ;;  %s927_s22 = smov %s624_s23 }
  0x8a   : > { %p23_p5 = scmp.ge.s32.totalorder %s26_s0, 4   ;;  %s928_s23 = smov %s628_s24 }
  0x8b   : > { %s929_s24 = smov %s739_s8  ;;  %s930_s25 = smov %s636_s26 }
  0x8c   : > { %s931_s26 = smov %s933_s29  ;;  %25 = sbr.rel (!%p23_p5) target bundleno = 20 (0x14), region = 90 }
  0x93   :  { %299 = vsyncpa [#allocation5], 1 }
  0x94   :  { %301 = vsyncpa [#allocation5 + $0x1], 1 }
  0x95   :  { %302 = vsyncpa [#allocation8], 1 }
  0x96   :  { %304 = vsyncpa [#allocation8 + $0x1], 1 }
  0x97   :  { %305 = vsyncpa [#allocation6], 1 }
  0x98   :  { %307 = vsyncpa [#allocation6 + $0x1], 1 }

</bundles_post_ra>
